<compile_context>
chip_gen: v5e
topology: v5e:2x2
jax: 0.10.0
libtpu: 0.0.40
codegen_flags: <defaults>
</compile_context>

<pallas_src>
import functools
import math

import jax
import jax.numpy as jnp
from jax.experimental import pallas as pl
from jax.experimental.pallas import tpu as pltpu

LOG_2PI = math.log(2.0 * math.pi)


def _round_up(a, b):
    return (a + b - 1) // b * b


def _logkde_kernel(q_ref, phi_ref, plo_ref, pns_ref, out_ref,
                   qhi_scr, qlo_scr, qns_scr, m_scr, s_scr, *,
                   cross_scale, neg_half_inv_bw2, const_term):
    """One (query-block, point-block) step of an online-logsumexp KDE."""
    j = pl.program_id(1)

    # Query-block-invariant prep + accumulator init, once per query block.
    @pl.when(j == 0)
    def _():
        q = q_ref[...]                                        # (TQ, Dp) f32
        q_hi = q.astype(jnp.bfloat16)
        q_lo = (q - q_hi.astype(jnp.float32)).astype(jnp.bfloat16)
        qhi_scr[...] = q_hi
        qlo_scr[...] = q_lo
        qns_scr[...] = jnp.sum(q * q, axis=1, keepdims=True) * neg_half_inv_bw2
        m_scr[...] = jnp.full(m_scr.shape, -jnp.inf, m_scr.dtype)
        s_scr[...] = jnp.zeros(s_scr.shape, s_scr.dtype)

    q_hi = qhi_scr[...]                                       # (TQ, Dp) bf16
    q_lo = qlo_scr[...]
    p_hi = phi_ref[...]                                       # (Dp, TP) bf16
    p_lo = plo_ref[...]

    # Cross term on the MXU; bf16 hi/lo (3 passes) ~ f32 accuracy.
    cross = jnp.dot(q_hi, p_hi, preferred_element_type=jnp.float32)
    cross += jnp.dot(q_hi, p_lo, preferred_element_type=jnp.float32)
    cross += jnp.dot(q_lo, p_hi, preferred_element_type=jnp.float32)

    # logits = -(||q||^2 + ||p||^2 - 2 q.p) / (2 bw^2)
    #        = qn_s + pn_s + cross / bw^2.
    # Padded point columns carry pn_s = -1e30 and thus self-mask (exp -> 0).
    logits = (qns_scr[...] + pns_ref[...]) + cross * cross_scale
    # Guard tiny cancellation (sqrdist slightly < 0) so logits stay <= 0.
    logits = jnp.minimum(logits, 0.0)

    # Online logsumexp over point blocks.
    m_prev = m_scr[...]
    m_new = jnp.maximum(m_prev, jnp.max(logits, axis=1, keepdims=True))
    alpha = jnp.exp(m_prev - m_new)
    s_scr[...] = alpha * s_scr[...] + jnp.sum(jnp.exp(logits - m_new),
                                              axis=1, keepdims=True)
    m_scr[...] = m_new

    @pl.when(j == pl.num_programs(1) - 1)
    def _():
        out_ref[...] = m_scr[...] + jnp.log(s_scr[...]) + const_term


def kde_forward(x, points, bandwidth):
    """Pallas forward of KernelDensityLayer.

    x: (1, Q, D) or (Q, D);  points: (P, 1, D) or (P, D).
    Returns (Q,) float32 log kernel-density estimates.
    """
    if x.ndim == 3:
        x = x[0]                          # x.squeeze(0)
    if points.ndim == 3:
        points = points[:, 0, :]          # points.squeeze(1)
    x = x.astype(jnp.float32)
    points = points.astype(jnp.float32)

    Q, D = x.shape
    P = points.shape[0]

    bw = float(bandwidth)
    neg_half_inv_bw2 = -1.0 / (2.0 * bw * bw)
    cross_scale = 1.0 / (bw * bw)
    const_term = -math.log(P) - D * (math.log(bw) + 0.5 * LOG_2PI)

    # ---------------- tile sizing ----------------
    Dp = _round_up(D, 8)
    Qp8 = _round_up(Q, 8)

    # Query tile: big (point HBM traffic ~ Qp/TQ), but keep >=2 query blocks
    # when Q permits so both TensorCores get work on v7x.
    TQ = min(Qp8, 512)
    if Qp8 // TQ < 2 and Qp8 >= 32:
        TQ = _round_up(Qp8 // 2, 8)

    def _vmem_bytes(tq, tp):
        pts = 2 * (2 * Dp * tp * 2 + tp * 4)   # hi+lo bf16 + pn f32, dbl-buf
        qrb = 2 * tq * Dp * 4 + 2 * tq * 4     # query block + out, dbl-buf
        scr = 2 * tq * Dp * 2 + 3 * tq * 4     # scratch
        tmp = 6 * tq * tp * 4                  # (TQ,TP) f32 temporaries
        return pts + qrb + scr + tmp

    # Point tile: largest 128-multiple that is useful (<= round_up(P,128)) and
    # keeps the working set under ~24 MiB (re-derived limit safe for v7x).
    P128 = _round_up(P, 128)
    TP = 128
    for cand in (256, 512, 1024, 2048):
        if cand <= P128 and _vmem_bytes(TQ, cand) <= (24 << 20):
            TP = cand
    while TQ > 8 and _vmem_bytes(TQ, TP) > (24 << 20):
        TQ = _round_up(TQ // 2, 8)

    Qp = _round_up(Qp8, TQ)
    Pp = _round_up(P, TP)

    vmem_limit = int(min(48 << 20,
                         max(32 << 20, _vmem_bytes(TQ, TP) + (8 << 20))))

    # ---------------- host-side prep ----------------
    # Query padding (zero pad is harmless for the dot / norms).
    q_pad = jnp.zeros((Qp, Dp), jnp.float32).at[:Q, :D].set(x)

    # Point side: in the real module `points` is a static buffer, so all of
    # this would be cached at set_points()/init time.
    pt_t = jnp.zeros((Dp, Pp), jnp.float32).at[:D, :P].set(points.T)
    p_hi = pt_t.astype(jnp.bfloat16)
    p_lo = (pt_t - p_hi.astype(jnp.float32)).astype(jnp.bfloat16)
    pn_s = jnp.sum(pt_t * pt_t, axis=0, keepdims=True) * neg_half_inv_bw2
    col = jnp.arange(Pp, dtype=jnp.int32)[None, :]
    pn_s = jnp.where(col < P, pn_s, jnp.float32(-1e30))   # padded cols self-mask

    kernel = functools.partial(
        _logkde_kernel,
        cross_scale=cross_scale,
        neg_half_inv_bw2=neg_half_inv_bw2,
        const_term=const_term,
    )

    grid = (Qp // TQ, Pp // TP)
    out = pl.pallas_call(
        kernel,
        out_shape=jax.ShapeDtypeStruct((Qp, 1), jnp.float32),
        grid=grid,
        in_specs=[
            pl.BlockSpec((TQ, Dp), lambda i, j: (i, 0)),   # query block
            pl.BlockSpec((Dp, TP), lambda i, j: (0, j)),   # points^T hi (bf16)
            pl.BlockSpec((Dp, TP), lambda i, j: (0, j)),   # points^T lo (bf16)
            pl.BlockSpec((1, TP), lambda i, j: (0, j)),    # scaled ||p||^2
        ],
        out_specs=pl.BlockSpec((TQ, 1), lambda i, j: (i, 0)),
        scratch_shapes=[
            pltpu.VMEM((TQ, Dp), jnp.bfloat16),   # q_hi
            pltpu.VMEM((TQ, Dp), jnp.bfloat16),   # q_lo
            pltpu.VMEM((TQ, 1), jnp.float32),     # scaled ||q||^2
            pltpu.VMEM((TQ, 1), jnp.float32),     # running max
            pltpu.VMEM((TQ, 1), jnp.float32),     # running sum
        ],
        compiler_params=pltpu.CompilerParams(
            dimension_semantics=("parallel", "arbitrary"),
            vmem_limit_bytes=vmem_limit),
    )(q_pad, p_hi, p_lo, pn_s)

    return out[:Q, 0]


def reference_logkde(x, points, bandwidth):
    """Pure-JAX (XLA) reference with the PyTorch torch_logkde semantics."""
    if x.ndim == 3:
        x = x[0]
    if points.ndim == 3:
        points = points[:, 0, :]
    P, D = points.shape
    sqr = jnp.sum((x[:, None, :] - points[None, :, :]) ** 2, axis=2)
    logits = -sqr / (2.0 * bandwidth * bandwidth)
    m = jnp.max(logits, axis=1, keepdims=True)
    lse = (m + jnp.log(jnp.sum(jnp.exp(logits - m), axis=1, keepdims=True)))[:, 0]
    return lse - math.log(P) - D * (math.log(bandwidth) + 0.5 * LOG_2PI)


if __name__ == "__main__":
    Q, D, P = 32, 8, 200
    bandwidth = 0.7

    key = jax.random.PRNGKey(0)
    kq, kp = jax.random.split(key)
    x = jax.random.normal(kq, (1, Q, D), jnp.float32)        # module input (pre-squeeze(0))
    points = jax.random.normal(kp, (P, 1, D), jnp.float32)   # buffer (pre-squeeze(1))

    out = kde_forward(x, points, bandwidth)
    out = jax.block_until_ready(out)
    assert out.shape == (Q,)

    ref = reference_logkde(x, points, bandwidth)
    err = float(jnp.max(jnp.abs(out - ref)))
    if not (err < 1e-3):
        raise AssertionError(f"Pallas KDE mismatch vs reference, max |err|={err}")

    print("KERNEL_OK")
</pallas_src>

<mosaic_0001>
module attributes {stable_mosaic.version = 11 : i64} {
  func.func @_logkde_kernel(%arg0: i32, %arg1: i32, %arg2: memref<16x8xf32, #tpu.memory_space<vmem>>, %arg3: memref<8x256xbf16, #tpu.memory_space<vmem>>, %arg4: memref<8x256xbf16, #tpu.memory_space<vmem>>, %arg5: memref<1x256xf32, #tpu.memory_space<vmem>>, %arg6: memref<16x1xf32, #tpu.memory_space<vmem>>, %arg7: memref<16x8xbf16, #tpu.memory_space<vmem>>, %arg8: memref<16x8xbf16, #tpu.memory_space<vmem>>, %arg9: memref<16x1xf32, #tpu.memory_space<vmem>>, %arg10: memref<16x1xf32, #tpu.memory_space<vmem>>, %arg11: memref<16x1xf32, #tpu.memory_space<vmem>>) attributes {dimension_semantics = [#tpu.dimension_semantics<parallel>, #tpu.dimension_semantics<arbitrary>], iteration_bounds = array<i64: 2, 1>, scalar_prefetch = 0 : i64, scratch_operands = 5 : i64, tpu.core_type = #tpu.core_type<tc>, window_params = [{transform_indices = @transform_0, window_bounds = array<i64: 16, 8>}, {transform_indices = @transform_1, window_bounds = array<i64: 8, 256>}, {transform_indices = @transform_2, window_bounds = array<i64: 8, 256>}, {transform_indices = @transform_3, window_bounds = array<i64: 1, 256>}, {transform_indices = @transform_4, window_bounds = array<i64: 16, 1>}]} {
    %c0_i32 = arith.constant 0 : i32
    %0 = arith.cmpi eq, %arg1, %c0_i32 : i32
    %1 = arith.extui %0 : i1 to i32
    %c0_i32_0 = arith.constant 0 : i32
    %2 = arith.cmpi ne, %1, %c0_i32_0 : i32
    scf.if %2 {
      %c0_28 = arith.constant 0 : index
      %c0_29 = arith.constant 0 : index
      %41 = vector.load %arg2[%c0_28, %c0_29] : memref<16x8xf32, #tpu.memory_space<vmem>>, vector<16x8xf32>
      %42 = arith.truncf %41 : vector<16x8xf32> to vector<16x8xbf16>
      %43 = arith.extf %42 : vector<16x8xbf16> to vector<16x8xf32>
      %44 = arith.subf %41, %43 : vector<16x8xf32>
      %45 = arith.truncf %44 : vector<16x8xf32> to vector<16x8xbf16>
      %c0_30 = arith.constant 0 : index
      %c0_31 = arith.constant 0 : index
      %46 = vector.load %arg7[%c0_30, %c0_31] : memref<16x8xbf16, #tpu.memory_space<vmem>>, vector<16x8xbf16>
      tpu.vector_store %arg7[%c0_30, %c0_31], %42 {strides = array<i32>} : memref<16x8xbf16, #tpu.memory_space<vmem>>, vector<16x8xbf16>,
      %c0_32 = arith.constant 0 : index
      %c0_33 = arith.constant 0 : index
      %47 = vector.load %arg8[%c0_32, %c0_33] : memref<16x8xbf16, #tpu.memory_space<vmem>>, vector<16x8xbf16>
      tpu.vector_store %arg8[%c0_32, %c0_33], %45 {strides = array<i32>} : memref<16x8xbf16, #tpu.memory_space<vmem>>, vector<16x8xbf16>,
      %48 = arith.mulf %41, %41 : vector<16x8xf32>
      %cst_34 = arith.constant dense<0.000000e+00> : vector<16xf32>
      %49 = vector.multi_reduction <add>, %48, %cst_34 [1] : vector<16x8xf32> to vector<16xf32>
      %50 = vector.shape_cast %49 : vector<16xf32> to vector<16x1xf32>
      %cst_35 = arith.constant -1.02040815 : f32
      %51 = vector.broadcast %cst_35 : f32 to vector<16x1xf32>
      %52 = arith.mulf %50, %51 : vector<16x1xf32>
      %c0_36 = arith.constant 0 : index
      %c0_37 = arith.constant 0 : index
      %53 = vector.load %arg9[%c0_36, %c0_37] : memref<16x1xf32, #tpu.memory_space<vmem>>, vector<16x1xf32>
      tpu.vector_store %arg9[%c0_36, %c0_37], %52 {strides = array<i32>} : memref<16x1xf32, #tpu.memory_space<vmem>>, vector<16x1xf32>,
      %cst_38 = arith.constant 0xFF800000 : f32
      %54 = vector.broadcast %cst_38 : f32 to vector<16x1xf32>
      %c0_39 = arith.constant 0 : index
      %c0_40 = arith.constant 0 : index
      %55 = vector.load %arg10[%c0_39, %c0_40] : memref<16x1xf32, #tpu.memory_space<vmem>>, vector<16x1xf32>
      tpu.vector_store %arg10[%c0_39, %c0_40], %54 {strides = array<i32>} : memref<16x1xf32, #tpu.memory_space<vmem>>, vector<16x1xf32>,
      %cst_41 = arith.constant 0.000000e+00 : f32
      %56 = vector.broadcast %cst_41 : f32 to vector<16x1xf32>
      %c0_42 = arith.constant 0 : index
      %c0_43 = arith.constant 0 : index
      %57 = vector.load %arg11[%c0_42, %c0_43] : memref<16x1xf32, #tpu.memory_space<vmem>>, vector<16x1xf32>
      tpu.vector_store %arg11[%c0_42, %c0_43], %56 {strides = array<i32>} : memref<16x1xf32, #tpu.memory_space<vmem>>, vector<16x1xf32>,
    } else {
    }
    %c0 = arith.constant 0 : index
    %c0_1 = arith.constant 0 : index
    %3 = vector.load %arg7[%c0, %c0_1] : memref<16x8xbf16, #tpu.memory_space<vmem>>, vector<16x8xbf16>
    %c0_2 = arith.constant 0 : index
    %c0_3 = arith.constant 0 : index
    %4 = vector.load %arg8[%c0_2, %c0_3] : memref<16x8xbf16, #tpu.memory_space<vmem>>, vector<16x8xbf16>
    %c0_4 = arith.constant 0 : index
    %c0_5 = arith.constant 0 : index
    %5 = vector.load %arg3[%c0_4, %c0_5] : memref<8x256xbf16, #tpu.memory_space<vmem>>, vector<8x256xbf16>
    %c0_6 = arith.constant 0 : index
    %c0_7 = arith.constant 0 : index
    %6 = vector.load %arg4[%c0_6, %c0_7] : memref<8x256xbf16, #tpu.memory_space<vmem>>, vector<8x256xbf16>
    %cst = arith.constant dense<0.000000e+00> : vector<16x256xf32>
    %7 = tpu.matmul %3, %5, %cst {dimension_numbers = #tpu.dot_dimension_numbers<[1], [0], [0], [1], [0, 0, 1, 1], [], []>} : vector<16x8xbf16>, vector<8x256xbf16>, vector<16x256xf32> -> vector<16x256xf32>
    %cst_8 = arith.constant dense<0.000000e+00> : vector<16x256xf32>
    %8 = tpu.matmul %3, %6, %cst_8 {dimension_numbers = #tpu.dot_dimension_numbers<[1], [0], [0], [1], [0, 0, 1, 1], [], []>} : vector<16x8xbf16>, vector<8x256xbf16>, vector<16x256xf32> -> vector<16x256xf32>
    %9 = arith.addf %7, %8 : vector<16x256xf32>
    %cst_9 = arith.constant dense<0.000000e+00> : vector<16x256xf32>
    %10 = tpu.matmul %4, %5, %cst_9 {dimension_numbers = #tpu.dot_dimension_numbers<[1], [0], [0], [1], [0, 0, 1, 1], [], []>} : vector<16x8xbf16>, vector<8x256xbf16>, vector<16x256xf32> -> vector<16x256xf32>
    %11 = arith.addf %9, %10 : vector<16x256xf32>
    %c0_10 = arith.constant 0 : index
    %c0_11 = arith.constant 0 : index
    %12 = vector.load %arg9[%c0_10, %c0_11] : memref<16x1xf32, #tpu.memory_space<vmem>>, vector<16x1xf32>
    %c0_12 = arith.constant 0 : index
    %c0_13 = arith.constant 0 : index
    %13 = vector.load %arg5[%c0_12, %c0_13] : memref<1x256xf32, #tpu.memory_space<vmem>>, vector<1x256xf32>
    %14 = vector.broadcast %12 : vector<16x1xf32> to vector<16x256xf32>
    %15 = vector.broadcast %13 : vector<1x256xf32> to vector<16x256xf32>
    %16 = arith.addf %14, %15 : vector<16x256xf32>
    %cst_14 = arith.constant 2.04081631 : f32
    %17 = vector.broadcast %cst_14 : f32 to vector<16x256xf32>
    %18 = arith.mulf %11, %17 : vector<16x256xf32>
    %19 = arith.addf %16, %18 : vector<16x256xf32>
    %cst_15 = arith.constant 0.000000e+00 : f32
    %20 = vector.broadcast %cst_15 : f32 to vector<16x256xf32>
    %21 = arith.minimumf %19, %20 : vector<16x256xf32>
    %c0_16 = arith.constant 0 : index
    %c0_17 = arith.constant 0 : index
    %22 = vector.load %arg10[%c0_16, %c0_17] : memref<16x1xf32, #tpu.memory_space<vmem>>, vector<16x1xf32>
    %cst_18 = arith.constant dense<0xFF800000> : vector<16xf32>
    %23 = vector.multi_reduction <maximumf>, %21, %cst_18 [1] : vector<16x256xf32> to vector<16xf32>
    %24 = vector.shape_cast %23 : vector<16xf32> to vector<16x1xf32>
    %25 = arith.maximumf %22, %24 : vector<16x1xf32>
    %26 = arith.subf %22, %25 : vector<16x1xf32>
    %27 = math.exp %26 : vector<16x1xf32>
    %c0_19 = arith.constant 0 : index
    %c0_20 = arith.constant 0 : index
    %28 = vector.load %arg11[%c0_19, %c0_20] : memref<16x1xf32, #tpu.memory_space<vmem>>, vector<16x1xf32>
    %29 = arith.mulf %27, %28 : vector<16x1xf32>
    %30 = vector.broadcast %25 : vector<16x1xf32> to vector<16x256xf32>
    %31 = arith.subf %21, %30 : vector<16x256xf32>
    %32 = math.exp %31 : vector<16x256xf32>
    %cst_21 = arith.constant dense<0.000000e+00> : vector<16xf32>
    %33 = vector.multi_reduction <add>, %32, %cst_21 [1] : vector<16x256xf32> to vector<16xf32>
    %34 = vector.shape_cast %33 : vector<16xf32> to vector<16x1xf32>
    %35 = arith.addf %29, %34 : vector<16x1xf32>
    %c0_22 = arith.constant 0 : index
    %c0_23 = arith.constant 0 : index
    %36 = vector.load %arg11[%c0_22, %c0_23] : memref<16x1xf32, #tpu.memory_space<vmem>>, vector<16x1xf32>
    tpu.vector_store %arg11[%c0_22, %c0_23], %35 {strides = array<i32>} : memref<16x1xf32, #tpu.memory_space<vmem>>, vector<16x1xf32>,
    %c0_24 = arith.constant 0 : index
    %c0_25 = arith.constant 0 : index
    %37 = vector.load %arg10[%c0_24, %c0_25] : memref<16x1xf32, #tpu.memory_space<vmem>>, vector<16x1xf32>
    tpu.vector_store %arg10[%c0_24, %c0_25], %25 {strides = array<i32>} : memref<16x1xf32, #tpu.memory_space<vmem>>, vector<16x1xf32>,
    %c0_i32_26 = arith.constant 0 : i32
    %38 = arith.cmpi eq, %arg1, %c0_i32_26 : i32
    %39 = arith.extui %38 : i1 to i32
    %c0_i32_27 = arith.constant 0 : i32
    %40 = arith.cmpi ne, %39, %c0_i32_27 : i32
    scf.if %40 {
      %c0_28 = arith.constant 0 : index
      %c0_29 = arith.constant 0 : index
      %41 = vector.load %arg10[%c0_28, %c0_29] : memref<16x1xf32, #tpu.memory_space<vmem>>, vector<16x1xf32>
      %c0_30 = arith.constant 0 : index
      %c0_31 = arith.constant 0 : index
      %42 = vector.load %arg11[%c0_30, %c0_31] : memref<16x1xf32, #tpu.memory_space<vmem>>, vector<16x1xf32>
      %43 = math.log %42 : vector<16x1xf32>
      %44 = arith.addf %41, %43 : vector<16x1xf32>
      %cst_32 = arith.constant -9.79642581 : f32
      %45 = vector.broadcast %cst_32 : f32 to vector<16x1xf32>
      %46 = arith.addf %44, %45 : vector<16x1xf32>
      %c0_33 = arith.constant 0 : index
      %c0_34 = arith.constant 0 : index
      %47 = vector.load %arg6[%c0_33, %c0_34] : memref<16x1xf32, #tpu.memory_space<vmem>>, vector<16x1xf32>
      tpu.vector_store %arg6[%c0_33, %c0_34], %46 {strides = array<i32>} : memref<16x1xf32, #tpu.memory_space<vmem>>, vector<16x1xf32>,
    } else {
    }
    return
  }
  func.func @transform_0(%arg0: i32, %arg1: i32) -> (i32, i32) {
    %c0_i32 = arith.constant 0 : i32
    %c0_i32_0 = arith.constant 0 : i32
    return %arg0, %c0_i32 : i32, i32
  }
  func.func @transform_1(%arg0: i32, %arg1: i32) -> (i32, i32) {
    %c0_i32 = arith.constant 0 : i32
    %c0_i32_0 = arith.constant 0 : i32
    return %c0_i32, %arg1 : i32, i32
  }
  func.func @transform_2(%arg0: i32, %arg1: i32) -> (i32, i32) {
    %c0_i32 = arith.constant 0 : i32
    %c0_i32_0 = arith.constant 0 : i32
    return %c0_i32, %arg1 : i32, i32
  }
  func.func @transform_3(%arg0: i32, %arg1: i32) -> (i32, i32) {
    %c0_i32 = arith.constant 0 : i32
    %c0_i32_0 = arith.constant 0 : i32
    return %c0_i32, %arg1 : i32, i32
  }
  func.func @transform_4(%arg0: i32, %arg1: i32) -> (i32, i32) {
    %c0_i32 = arith.constant 0 : i32
    %c0_i32_0 = arith.constant 0 : i32
    return %arg0, %c0_i32 : i32, i32
  }
}

</mosaic_0001>

<bundles_post_ra>
// kernel: tpu_custom_call.1
= control target key start
LH: loop header
LB: loop body
LE: loop exit
PB: predicated region body
PF: predicated region fallthrough
CT: control target
= control target key end

     0   :  { %s788_s15 = smov 0   ;;  %s790_s16 = smov 0   ;;  %s861_s0 = inlined_call_operand.vmem [shape: f32[32,8], index: 0, kind: input, shape index: {}]   ;;  %s862_s1 = inlined_call_operand.vmem [shape: bf16[8,256], index: 1, kind: input, shape index: {}]   ;;  %s863_s2 = inlined_call_operand.vmem [shape: bf16[8,256], index: 2, kind: input, shape index: {}]   ;;  %s864_s3 = inlined_call_operand.vmem [shape: f32[1,256], index: 3, kind: input, shape index: {}]   ;;  %s865_s4 = inlined_call_operand.vmem [shape: f32[32,1], index: 4, kind: output, shape index: {}]  }
   0x1   :  { %s792_s17 = smov 0  }
   0x2 LB: > { %s26_s18 = sadd.s32 1, %s754_s16  ;;  %p668_p0 = scmp.ge.s32.totalorder %s758_s17, 1  ;;  %s758_s17 = sphi %s792_s17, %s14_s17   ;;  %s754_s16 = sphi %s790_s16, %s867_s16   ;;  %s750_s15 = sphi %s788_s15, %s866_s15  }
   0x3   : > { %p28_p1 = scmp.ge.s32.totalorder %s26_s18, 2  ;;  %p207_p2 = scmp.lt.s32.totalorder %s758_s17, 3 }
   0x5   : > { %s869_s18 = smov (%p28_p1, %s26_s18), 0  ;;  %p208_p3 = pnand %p668_p0, %p207_p2 }
   0x6   : > { %s669_s19 = sshll.u32 (!%p208_p3), %s750_s15, 1 }
   0x7   : > { %211 = sbr.rel (%p208_p3) target bundleno = 664 (0x298), region = 36  ;;  %p248_p4 = scmp.lt.s32.totalorder (!%p208_p3), %s669_s19, 3 }
   0xc   : > { %v319_v0 = vld [vmem:[%s863_s2] sm:$0xff]  ;;  %vm334_vm0 = vcmask 1043456   ;;  %s871_s19 = smov (!%p248_p4, %s669_s19), 3  ;;  %vm291_vm1 = vcmask 60416   ;;  %vm298_vm2 = vcmask 64512   ;;  %v760_v30 = vmov 0  }
   0xd   : > { %v318_v1 = vld [vmem:[%s862_s1] sm:$0xff]  ;;  %v326_v2 = vunpack.c.l.b16 %v319_v0  ;;  %v327_v3 = vunpack.c.h.b16 %v319_v0  ;;  %s670_s24 = sshll.u32 %s871_s19, 3  ;;  %718 = vset.pattern.permute.xlu1 %v760_v30  ;;  %719 = vset.pattern.permute.xlu0 %v760_v30  ;;  %vm307_vm3 = vcmask 7168   ;;  %v761_v41 = vmov -inf  }
   0xe   : > { %v370_v4 = vunpack.c.l.b16 %v318_v1  ;;  %v371_v5 = vunpack.c.h.b16 %v318_v1  ;;  %s251_s27 = scalar_lea.vmem %s861_s0, %s670_s24  ;;  %310 = vst.msk [vmem:[#allocation5] sm:$0xff] %vm307_vm3, %v761_v41  ;;  %v450_v48 = vld [vmem:[%s864_s3] sm:$0x3]  ;;  %s274_s6 = scalar_lea.vmem %s865_s4, %s670_s24 }
   0xf   : > { %v328_v6 = vpack.c.b16 %v326_v2, %v326_v2  ;;  %v329_v7 = vpack.c.b16 %v327_v3, %v327_v3  ;;  %v281_v14 = vld [vmem:[%s251_s27] sm:$0xff]  ;;  %v282_v15 = vld [vmem:[%s251_s27 + $0x8] sm:$0xff]  ;;  %311 = vst.msk [vmem:[#allocation5 + $0x8] sm:$0xff] %vm307_vm3, %v761_v41  ;;  %v462_v53 = vperm.slane %v450_v48, 0  ;;  %v463_v54 = vperm.slane %v450_v48, 1 }
  0x10   : > { %v372_v8 = vpack.c.b16 %v370_v4, %v370_v4  ;;  %v373_v9 = vpack.c.b16 %v371_v5, %v371_v5  ;;  %v296_v16 = vmul.f32 %v281_v14, %v281_v14  ;;  %v283_v17 = vpack.c.bf16 %v281_v14, %v281_v14 }
  0x11   : > { %v336_v10 = vsel %vm334_vm0, %v328_v6, 0  ;;  %v339_v11 = vsel %vm334_vm0, %v329_v7, 0  ;;  %v284_v18 = vpack.c.bf16 %v282_v15, %v282_v15  ;;  %v297_v24 = vmul.f32 %v282_v15, %v282_v15 }
  0x12   : > { %v375_v12 = vsel %vm334_vm0, %v372_v8, 0  ;;  %v378_v13 = vsel %vm334_vm0, %v373_v9, 0  ;;  %348 = vmatpush.bf16.msra.mxu0 %v336_v10  ;;  %362 = vmatpush.bf16.msra.mxu1 %v339_v11  ;;  %v299_v19 = vsel %vm298_vm2, %v296_v16, 0.0  ;;  %v285_v20 = vunpack.c.l.bf16 %v283_v17  ;;  %292 = vst.msk [vmem:[#allocation2] sm:$0xf] %vm291_vm1, %v283_v17 }
  0x13   : > { %387 = vmatpush.bf16.msra.mxu2 %v375_v12  ;;  %401 = vmatpush.bf16.msra.mxu3 %v378_v13  ;;  %v286_v21 = vunpack.c.l.bf16 %v284_v18  ;;  %293 = vst.msk [vmem:[#allocation2 + $0x4] sm:$0xf] %vm291_vm1, %v284_v18  ;;  %v302_v27 = vsel %vm298_vm2, %v297_v24, 0.0  ;;  %v762_v17 = vmov 0.0  }
  0x14   : > { %300 = vadd.xlane.f32.xlu0 %v299_v19  ;;  %v287_v22 = vsub.f32 %v281_v14, %v285_v20  ;;  %312 = vst.msk [vmem:[#allocation6] sm:$0xff] %vm307_vm3, %v762_v17 }
  0x15   : > { %v288_v23 = vsub.f32 %v282_v15, %v286_v21  ;;  %313 = vst.msk [vmem:[#allocation6 + $0x8] sm:$0xff] %vm307_vm3, %v762_v17  ;;  %v482_v18 = vld [vmem:[#allocation5] sm:$0xff] }
  0x16   : > { %423 = vmatpush.bf16.msrb.mxu0 %v375_v12  ;;  %437 = vmatpush.bf16.msrb.mxu1 %v378_v13  ;;  %v289_v25 = vpack.c.bf16 %v287_v22, %v287_v22  ;;  %v483_v22 = vld [vmem:[#allocation5 + $0x8] sm:$0xff] }
  0x17   : > { %v290_v26 = vpack.c.bf16 %v288_v23, %v288_v23 }
  0x18   : > { %294 = vst.msk [vmem:[#allocation3] sm:$0xf] %vm291_vm1, %v289_v25 }
  0x19   : > { %295 = vst.msk [vmem:[#allocation3 + $0x4] sm:$0xf] %vm291_vm1, %v290_v26 }
  0x1a   : > { %v689_v28 = vld [vmem:[#allocation2] sm:$0xff] }
  0x1b   : > { %677 = vmatmul.msk.bf16.vlgmr.msra.gmra.mxu0 %vm298_vm2, %v689_v28  ;;  %678 = vmatmul.msk.bf16.vlgmr.msra.gmra.mxu1 %vm298_vm2, %v689_v28 }
  0x1c   : > { %303 = vadd.xlane.f32.xlu0 %v302_v27  ;;  %679 = vmatmul.msk.bf16.vlgmr.msra.gmra.mxu2 %vm298_vm2, %v689_v28 }
  0x1d   : > { %680 = vmatmul.msk.bf16.vlgmr.msra.gmra.mxu3 %vm298_vm2, %v689_v28 }
  0x20   : > { %v690_v29 = vld [vmem:[#allocation3] sm:$0xff] }
  0x2b   : > { %685 = vmatmul.msk.bf16.vlgmr.msrb.gmra.mxu0 %vm298_vm2, %v690_v29  ;;  %686 = vmatmul.msk.bf16.vlgmr.msrb.gmra.mxu1 %vm298_vm2, %v690_v29 }
  0x87   : > { %v301_v31 = vpop.xlane.xlu0 %300 }
  0x88   : > { %v305_v32 = vmul.f32 -1.0204082, %v301_v31 }
  0x8a   : > { %308 = vst.msk [vmem:[#allocation4] sm:$0xff] %vm307_vm3, %v305_v32 }
  0x8f   : > { %v304_v33 = vpop.xlane.xlu0 %303 }
  0x90   : > { %v306_v34 = vmul.f32 -1.0204082, %v304_v33 }
  0x91   : > { %v448_v35 = vld [vmem:[#allocation4] sm:$0xff] }
  0x92   : > { %309 = vst.msk [vmem:[#allocation4 + $0x8] sm:$0xff] %vm307_vm3, %v306_v34  ;;  %453 = vperm.xlu1 %718, %v448_v35  }
  0x98   : > { %v350_v37 = vpop.f32.mrf.mxu0  ;;  %v364_v38 = vpop.f32.mrf.mxu1 }
  0x99   : > { %v449_v36 = vld [vmem:[#allocation4 + $0x8] sm:$0xff] }
  0x9a   : > { %458 = vperm.xlu1 %718, %v449_v36  }
  0x9f   : > { %v389_v42 = vpop.f32.mrf.mxu2 }
  0xa0   : > { %v352_v39 = vpop.f32.mrf.mxu0  ;;  %v366_v40 = vpop.f32.mrf.mxu1  ;;  %v390_v46 = vadd.f32 %v389_v42, %v350_v37 }
  0xa1   : > { %v403_v43 = vpop.f32.mrf.mxu3 }
  0xa2   : > { %v404_v47 = vadd.f32 %v403_v43, %v364_v38 }
  0xa7   : > { %v391_v51 = vpop.f32.mrf.mxu2 }
  0xa8   : > { %v425_v44 = vpop.f32.mrf.mxu0  ;;  %v439_v45 = vpop.f32.mrf.mxu1  ;;  %v392_v55 = vadd.f32 %v391_v51, %v352_v39 }
  0xa9   : > { %v444_v49 = vadd.f32 %v425_v44, %v390_v46  ;;  %v445_v50 = vadd.f32 %v439_v45, %v404_v47  ;;  %v405_v52 = vpop.f32.mrf.mxu3  ;;  %v498_v45 = vld [vmem:[#allocation6] sm:$0xff] }
  0xaa   : > { %v406_v56 = vadd.f32 %v405_v52, %v366_v40 }
  0xab   : > { %v470_v58 = vmul.f32 2.0408163, %v444_v49  ;;  %v471_v59 = vmul.f32 2.0408163, %v445_v50  ;;  %v499_v50 = vld [vmem:[#allocation6 + $0x8] sm:$0xff] }
  0xb0   : > { %v427_v62 = vpop.f32.mrf.mxu0  ;;  %v441_v63 = vpop.f32.mrf.mxu1 }
  0xb1   : > { %v446_v2 = vadd.f32 %v427_v62, %v392_v55  ;;  %v447_v3 = vadd.f32 %v441_v63, %v406_v56 }
  0xb3   : > { %v472_v8 = vmul.f32 2.0408163, %v446_v2  ;;  %v473_v9 = vmul.f32 2.0408163, %v447_v3 }
 0x104   : > { %v454_v57 = vpop.permute.xlu1 %453 }
 0x105   : > { %v466_v60 = vadd.f32 %v462_v53, %v454_v57  ;;  %v467_v61 = vadd.f32 %v463_v54, %v454_v57 }
 0x107   : > { %v474_v0 = vadd.f32 %v470_v58, %v466_v60  ;;  %v475_v1 = vadd.f32 %v471_v59, %v467_v61 }
 0x109   : > { %v478_v4 = vmin.f32 %v474_v0, 0.0  ;;  %v479_v5 = vmin.f32 %v475_v1, 0.0 }
 0x10b   : > { %v484_v6 = vmax.f32 %v478_v4, %v479_v5 }
 0x10c   : > { %v459_v7 = vpop.permute.xlu1 %458 }
 0x10d   : > { %v468_v10 = vadd.f32 %v462_v53, %v459_v7  ;;  %v469_v11 = vadd.f32 %v463_v54, %v459_v7  ;;  %485 = vmax.xlane.f32.xlu2 %v484_v6 }
 0x10f   : > { %v476_v12 = vadd.f32 %v472_v8, %v468_v10  ;;  %v477_v13 = vadd.f32 %v473_v9, %v469_v11 }
 0x111   : > { %v480_v14 = vmin.f32 %v476_v12, 0.0  ;;  %v481_v15 = vmin.f32 %v477_v13, 0.0 }
 0x113   : > { %v487_v16 = vmax.f32 %v480_v14, %v481_v15 }
 0x115   : > { %488 = vmax.xlane.f32.xlu2 %v487_v16 }
 0x180   : > { %v486_v19 = vpop.xlane.xlu2 %485 }
 0x181   : > { %v490_v20 = vmax.f32 %v482_v18, %v486_v19 }
 0x183   : > { %v492_v21 = vsub.f32 %v482_v18, %v490_v20  ;;  %535 = vst.msk [vmem:[#allocation5] sm:$0xff] %vm307_vm3, %v490_v20  ;;  %504 = vperm.xlu0 %719, %v490_v20  }
 0x185   : > { %v494_v42 = vmul.f32 1.442695, %v492_v21 }
 0x188   : > { %v489_v23 = vpop.xlane.xlu2 %488 }
 0x189   : > { %v491_v24 = vmax.f32 %v483_v22, %v489_v23 }
 0x18a   : > { %v540_v58 = vld [vmem:[#allocation5] sm:$0xff] }
 0x18b   : > { %v493_v25 = vsub.f32 %v483_v22, %v491_v24  ;;  %536 = vst.msk [vmem:[#allocation5 + $0x8] sm:$0xff] %vm307_vm3, %v491_v24  ;;  %509 = vperm.xlu1 %718, %v491_v24  }
 0x18d   : > { %v496_v43 = vmul.f32 1.442695, %v493_v25 }
 0x192   : > { %v541_v63 = vld [vmem:[#allocation5 + $0x8] sm:$0xff] }
 0x1f5   : > { %v505_v26 = vpop.permute.xlu0 %504 }
 0x1f6   : > { %v512_v27 = vsub.f32 %v478_v4, %v505_v26  ;;  %v513_v28 = vsub.f32 %v479_v5, %v505_v26 }
 0x1f8   : > { %v516_v29 = vmul.f32 1.442695, %v512_v27  ;;  %v518_v30 = vmul.f32 1.442695, %v513_v28 }
 0x1fa   : > { %720 = vpow2.f32 %v516_v29 }
 0x1fb   : > { %722 = vpow2.f32 %v518_v30 }
 0x1fd   : > { %v510_v31 = vpop.permute.xlu1 %509 }
 0x1fe   : > { %v514_v32 = vsub.f32 %v480_v14, %v510_v31  ;;  %v515_v33 = vsub.f32 %v481_v15, %v510_v31 }
 0x200   : > { %v721_v34 = vpop.eup %720  ;;  %v520_v35 = vmul.f32 1.442695, %v514_v32  ;;  %v522_v36 = vmul.f32 1.442695, %v515_v33 }
 0x201   : > { %v723_v37 = vpop.eup %722 }
 0x202   : > { %724 = vpow2.f32 %v520_v35  ;;  %v524_v38 = vadd.f32 %v723_v37, %v721_v34 }
 0x203   : > { %726 = vpow2.f32 %v522_v36 }
 0x204   : > { %525 = vadd.xlane.f32.xlu2 %v524_v38  ;;  %728 = vpow2.f32 %v494_v42 }
 0x205   : > { %730 = vpow2.f32 %v496_v43 }
 0x208   : > { %v725_v39 = vpop.eup %724 }
 0x209   : > { %v727_v40 = vpop.eup %726 }
 0x20a   : > { %v527_v41 = vadd.f32 %v727_v40, %v725_v39  ;;  %v729_v44 = vpop.eup %728 }
 0x20b   : > { %v500_v46 = vmul.f32 %v729_v44, %v498_v45  ;;  %v731_v49 = vpop.eup %730 }
 0x20c   : > { %528 = vadd.xlane.f32.xlu1 %v527_v41  ;;  %v501_v51 = vmul.f32 %v731_v49, %v499_v50 }
 0x277   : > { %v526_v47 = vpop.xlane.xlu2 %525 }
 0x278   : > { %v530_v48 = vadd.f32 %v526_v47, %v500_v46 }
 0x27a   : > { %533 = vst.msk [vmem:[#allocation6] sm:$0xff] %vm307_vm3, %v530_v48 }
 0x27f   : > { %v529_v52 = vpop.xlane.xlu1 %528 }
 0x280   : > { %v531_v53 = vadd.f32 %v529_v52, %v501_v51 }
 0x281   : > { %v542_v54 = vld [vmem:[#allocation6] sm:$0xff] }
 0x282   : > { %732 = vlog2.f32 %v542_v54  ;;  %534 = vst.msk [vmem:[#allocation6 + $0x8] sm:$0xff] %vm307_vm3, %v531_v53 }
 0x288   : > { %v733_v55 = vpop.eup %732 }
 0x289   : > { %v545_v56 = vmul.f32 0.6931472, %v733_v55  ;;  %v543_v57 = vld [vmem:[#allocation6 + $0x8] sm:$0xff] }
 0x28a   : > { %734 = vlog2.f32 %v543_v57 }
 0x28b   : > { %v548_v59 = vadd.f32 %v545_v56, %v540_v58 }
 0x28d   : > { %v550_v60 = vadd.f32 -9.796426, %v548_v59 }
 0x28f   : > { %552 = vst.msk [vmem:[%s274_s6] sm:$0xff] %vm307_vm3, %v550_v60 }
 0x290   : > { %v735_v61 = vpop.eup %734 }
 0x291   : > { %v547_v62 = vmul.f32 0.6931472, %v735_v61 }
 0x293   : > { %v549_v0 = vadd.f32 %v547_v62, %v541_v63 }
 0x295   : > { %v551_v1 = vadd.f32 -9.796426, %v549_v0 }
 0x297   : > { %553 = vst.msk [vmem:[%s274_s6 + $0x8] sm:$0xff] %vm307_vm3, %v551_v1 }
 0x298 PF: > { %s14_s17 = sadd.s32 1, %s758_s17   ;;  %s866_s15 = smov %s754_s16 }
 0x299   : > { %p11_p5 = scmp.ge.s32.totalorder %s14_s17, 4   ;;  %s867_s16 = smov %s869_s18 }
 0x29b   :  { %13 = sbr.rel (!%p11_p5) target bundleno = 2 (0x2), region = 83 }

</bundles_post_ra>
